<compile_context>
chip_gen: v7x
topology: tpu7x:2x2x1
jax: 0.10.0
libtpu: 0.0.40
codegen_flags: <defaults>
</compile_context>

<pallas_src>
import functools
import math

import jax
import jax.numpy as jnp
import numpy as np
from jax.experimental import pallas as pl
from jax.experimental.pallas import tpu as pltpu


def _downsample_kernel(mx_ref, my_ref, ph_ref, w0_ref, wy_ref, wxe_ref, wxo_ref,
                       wd_ref, b_ref, o_ref, *, Wo, Cin):
    """One output tile of the 3x3 / stride-2 / pad-1 conv on phase-deinterleaved input.

    ph_ref : (4*Cin, tN) rows [ee; eo; oe; oo] stride-2 phase grids of x, lane index
             n = b*Ho*Wo + oy*Wo + ox (lane-dense).
    mx_ref : (1, tN) 1.0 where ox > 0 else 0.0   (left neighbour is real data)
    my_ref : (1, tN) 1.0 where oy > 0 else 0.0   (upper neighbour is real data)
    w0_ref : (Cout, 4*Cin) packed taps (1,1),(1,2),(2,1),(2,2)  -> no shift
    wy_ref : (Cout, 2*Cin) packed taps (0,1),(0,2)              -> need (oy-1, ox)
    wxe_ref: (Cout, Cin)   tap (1,0)                            -> need (oy, ox-1)
    wxo_ref: (Cout, Cin)   tap (2,0)                            -> need (oy, ox-1)
    wd_ref : (Cout, Cin)   tap (0,0)                            -> need (oy-1, ox-1)
    b_ref  : (Cout, 1)
    o_ref  : (Cout, tN)
    """
    ph = ph_ref[...]                       # (4*Cin, tN)
    eo = ph[Cin:2 * Cin]
    oo = ph[3 * Cin:4 * Cin]

    def mm(a, b):
        return jnp.dot(a, b, preferred_element_type=jnp.float32)

    y0 = mm(w0_ref[...], ph)                               # unshifted taps
    zy = mm(wy_ref[...], ph[2 * Cin:4 * Cin])              # value for (oy-1, ox), at source pos
    zx = mm(wxe_ref[...], eo) + mm(wxo_ref[...], oo)       # value for (oy, ox-1), at source pos
    zd = mm(wd_ref[...], oo)                               # value for (oy-1, ox-1), at source pos

    mx = mx_ref[...]                       # (1, tN)
    my = my_ref[...]                       # (1, tN)

    # Lane rolls (XLU) move each source-position partial result to its destination output lane;
    # the masks zero every destination whose source was the conv's zero padding (also exactly
    # where the roll wraps across an image / tile boundary).
    yx = pltpu.roll(zx, shift=1, axis=1) * mx
    yy = pltpu.roll(zy, shift=Wo, axis=1) * my
    yd = pltpu.roll(zd, shift=Wo + 1, axis=1) * (mx * my)

    o_ref[...] = (y0 + yx + yy + yd + b_ref[...]).astype(o_ref.dtype)


def _pick_tile_n(N, So, target):
    """Largest tile that divides N, covers whole images, is a multiple of 128, and ~<= target."""
    lcm = So * 128 // math.gcd(So, 128)
    if N % lcm != 0:
        return N                            # fall back: one full-width (still lane-dense) tile
    t = lcm
    while t * 2 <= target and N % (t * 2) == 0:
        t *= 2
    return t


def downsample_forward(x, w, b):
    """x: (B, C, H, W) NCHW; w: (Cout, Cin, 3, 3) OIHW; b: (Cout,). Returns (B, Cout, H//2, W//2)."""
    B, Cin, H, W = x.shape
    Cout = w.shape[0]
    # TODO(synk): odd H/W (PyTorch Conv2d stride=2 pad=1 allows it, Ho = (H-1)//2 + 1); the
    # stride-2 phase decomposition below assumes even H, W.
    assert H % 2 == 0 and W % 2 == 0, "phase decomposition assumes even H, W"
    Ho, Wo = H // 2, W // 2
    So = Ho * Wo
    N = B * So
    dtype = x.dtype

    # Phase-deinterleave x into its four stride-2 grids, lane-dense (pure relayout, same bytes
    # as x).  Row order: [ee; eo; oe; oo].
    def phase(r0, c0):
        t = x[:, :, r0::2, c0::2]                                    # (B, Cin, Ho, Wo)
        return jnp.transpose(t, (1, 0, 2, 3)).reshape(Cin, N)

    ph = jnp.concatenate([phase(0, 0), phase(0, 1), phase(1, 0), phase(1, 1)],
                         axis=0).astype(dtype)                       # (4*Cin, N)

    # Pre-packed weight groups (columns must match the phase row order above).
    wt = w.astype(dtype)
    w0 = jnp.concatenate([wt[:, :, 1, 1], wt[:, :, 1, 2],
                          wt[:, :, 2, 1], wt[:, :, 2, 2]], axis=1)   # (Cout, 4*Cin)
    wy = jnp.concatenate([wt[:, :, 0, 1], wt[:, :, 0, 2]], axis=1)   # (Cout, 2*Cin)  [oe, oo]
    wxe = wt[:, :, 1, 0]                                             # (Cout, Cin)   on eo
    wxo = wt[:, :, 2, 0]                                             # (Cout, Cin)   on oo
    wd = wt[:, :, 0, 0]                                              # (Cout, Cin)   on oo
    b2 = b.reshape(Cout, 1).astype(jnp.float32)

    # (1, N) lane masks: whether the left / upper source of this output lane is real data.
    n_idx = jnp.arange(N, dtype=jnp.int32)
    mask_x = ((n_idx % Wo) > 0).astype(jnp.float32).reshape(1, N)
    mask_y = (((n_idx % So) // Wo) > 0).astype(jnp.float32).reshape(1, N)

    # Tile the lane axis: whole images per tile, multiple of 128, sized to stay well under the
    # default scoped VMEM even for large channel counts (double-buffered by BlockSpec).
    bytes_per_lane = (4 * Cin + Cout + 2) * jnp.dtype(dtype).itemsize
    target = max(256, min(4096, (8 << 20) // max(1, bytes_per_lane)))
    tile_n = _pick_tile_n(N, So, target)
    grid = (N // tile_n,)

    def lane_spec(rows):
        return pl.BlockSpec((rows, tile_n), lambda i: (0, i))

    def full_spec(shape):
        nd = len(shape)
        return pl.BlockSpec(tuple(shape), lambda i, _nd=nd: (0,) * _nd)

    kernel = functools.partial(_downsample_kernel, Wo=Wo, Cin=Cin)
    out_cn = pl.pallas_call(
        kernel,
        out_shape=jax.ShapeDtypeStruct((Cout, N), dtype),
        grid_spec=pltpu.PrefetchScalarGridSpec(
            num_scalar_prefetch=0,
            grid=grid,
            in_specs=[
                lane_spec(1),               # mask_x
                lane_spec(1),               # mask_y
                lane_spec(4 * Cin),         # phases
                full_spec(w0.shape),
                full_spec(wy.shape),
                full_spec(wxe.shape),
                full_spec(wxo.shape),
                full_spec(wd.shape),
                full_spec(b2.shape),
            ],
            out_specs=lane_spec(Cout),
        ),
        compiler_params=pltpu.CompilerParams(dimension_semantics=("parallel",)),
    )(mask_x, mask_y, ph, w0, wy, wxe, wxo, wd, b2)

    # (Cout, B*Ho*Wo) -> NCHW.  (Keep (Cout, N) for the downstream consumer to avoid this
    # relayout in a fused pipeline.)
    return jnp.transpose(out_cn.reshape(Cout, B, Ho, Wo), (1, 0, 2, 3))


def reference_forward(x, w, b):
    """Pure-JAX reference: same math as torch.nn.Conv2d(C, C, 3, stride=2, padding=1)."""
    y = jax.lax.conv_general_dilated(
        x, w, window_strides=(2, 2), padding=((1, 1), (1, 1)),
        dimension_numbers=("NCHW", "OIHW", "NCHW"))
    return y + b[None, :, None, None]


if __name__ == "__main__":
    B, C, H, W = 2, 4, 16, 16
    key = jax.random.PRNGKey(0)
    kx, kw, kb = jax.random.split(key, 3)
    x = jax.random.normal(kx, (B, C, H, W), jnp.float32)          # NCHW, like PyTorch
    w = 0.1 * jax.random.normal(kw, (C, C, 3, 3), jnp.float32)    # Conv2d weight (OIHW)
    b = 0.1 * jax.random.normal(kb, (C,), jnp.float32)            # Conv2d bias

    fwd = jax.jit(downsample_forward)
    out = jax.block_until_ready(fwd(x, w, b))
    ref = jax.block_until_ready(reference_forward(x, w, b))
    assert out.shape == (B, C, H // 2, W // 2)
    np.testing.assert_allclose(np.asarray(out), np.asarray(ref), rtol=1e-4, atol=1e-4)
    print("KERNEL_OK")
</pallas_src>

<mosaic_0001>
module attributes {stable_mosaic.version = 11 : i64} {
  func.func @_downsample_kernel(%arg0: i32, %arg1: memref<1x128xf32, #tpu.memory_space<vmem>>, %arg2: memref<1x128xf32, #tpu.memory_space<vmem>>, %arg3: memref<16x128xf32, #tpu.memory_space<vmem>>, %arg4: memref<4x16xf32, #tpu.memory_space<vmem>>, %arg5: memref<4x8xf32, #tpu.memory_space<vmem>>, %arg6: memref<4x4xf32, #tpu.memory_space<vmem>>, %arg7: memref<4x4xf32, #tpu.memory_space<vmem>>, %arg8: memref<4x4xf32, #tpu.memory_space<vmem>>, %arg9: memref<4x1xf32, #tpu.memory_space<vmem>>, %arg10: memref<4x128xf32, #tpu.memory_space<vmem>>) attributes {dimension_semantics = [#tpu.dimension_semantics<parallel>], iteration_bounds = array<i64: 1>, scalar_prefetch = 0 : i64, scratch_operands = 0 : i64, tpu.core_type = #tpu.core_type<tc>, window_params = [{transform_indices = @transform_0, window_bounds = array<i64: 1, 128>}, {transform_indices = @transform_1, window_bounds = array<i64: 1, 128>}, {transform_indices = @transform_2, window_bounds = array<i64: 16, 128>}, {pipeline_mode = #tpu.pipeline_mode<synchronous>, transform_indices = @transform_3, window_bounds = array<i64: 4, 16>}, {pipeline_mode = #tpu.pipeline_mode<synchronous>, transform_indices = @transform_4, window_bounds = array<i64: 4, 8>}, {pipeline_mode = #tpu.pipeline_mode<synchronous>, transform_indices = @transform_5, window_bounds = array<i64: 4, 4>}, {pipeline_mode = #tpu.pipeline_mode<synchronous>, transform_indices = @transform_6, window_bounds = array<i64: 4, 4>}, {pipeline_mode = #tpu.pipeline_mode<synchronous>, transform_indices = @transform_7, window_bounds = array<i64: 4, 4>}, {pipeline_mode = #tpu.pipeline_mode<synchronous>, transform_indices = @transform_8, window_bounds = array<i64: 4, 1>}, {transform_indices = @transform_9, window_bounds = array<i64: 4, 128>}]} {
    %c0 = arith.constant 0 : index
    %c0_0 = arith.constant 0 : index
    %0 = vector.load %arg3[%c0, %c0_0] : memref<16x128xf32, #tpu.memory_space<vmem>>, vector<16x128xf32>
    %1 = vector.extract_strided_slice %0 {offsets = [4, 0], sizes = [4, 128], strides = [1, 1]} : vector<16x128xf32> to vector<4x128xf32>
    %2 = vector.extract_strided_slice %0 {offsets = [12, 0], sizes = [4, 128], strides = [1, 1]} : vector<16x128xf32> to vector<4x128xf32>
    %c0_1 = arith.constant 0 : index
    %c0_2 = arith.constant 0 : index
    %3 = vector.load %arg4[%c0_1, %c0_2] : memref<4x16xf32, #tpu.memory_space<vmem>>, vector<4x16xf32>
    %cst = arith.constant dense<0.000000e+00> : vector<4x128xf32>
    %4 = tpu.matmul %3, %0, %cst {dimension_numbers = #tpu.dot_dimension_numbers<[1], [0], [0], [1], [0, 0, 1, 1], [], []>} : vector<4x16xf32>, vector<16x128xf32>, vector<4x128xf32> -> vector<4x128xf32>
    %c0_3 = arith.constant 0 : index
    %c0_4 = arith.constant 0 : index
    %5 = vector.load %arg5[%c0_3, %c0_4] : memref<4x8xf32, #tpu.memory_space<vmem>>, vector<4x8xf32>
    %6 = vector.extract_strided_slice %0 {offsets = [8, 0], sizes = [8, 128], strides = [1, 1]} : vector<16x128xf32> to vector<8x128xf32>
    %cst_5 = arith.constant dense<0.000000e+00> : vector<4x128xf32>
    %7 = tpu.matmul %5, %6, %cst_5 {dimension_numbers = #tpu.dot_dimension_numbers<[1], [0], [0], [1], [0, 0, 1, 1], [], []>} : vector<4x8xf32>, vector<8x128xf32>, vector<4x128xf32> -> vector<4x128xf32>
    %c0_6 = arith.constant 0 : index
    %c0_7 = arith.constant 0 : index
    %8 = vector.load %arg6[%c0_6, %c0_7] : memref<4x4xf32, #tpu.memory_space<vmem>>, vector<4x4xf32>
    %cst_8 = arith.constant dense<0.000000e+00> : vector<4x128xf32>
    %9 = tpu.matmul %8, %1, %cst_8 {dimension_numbers = #tpu.dot_dimension_numbers<[1], [0], [0], [1], [0, 0, 1, 1], [], []>} : vector<4x4xf32>, vector<4x128xf32>, vector<4x128xf32> -> vector<4x128xf32>
    %c0_9 = arith.constant 0 : index
    %c0_10 = arith.constant 0 : index
    %10 = vector.load %arg7[%c0_9, %c0_10] : memref<4x4xf32, #tpu.memory_space<vmem>>, vector<4x4xf32>
    %cst_11 = arith.constant dense<0.000000e+00> : vector<4x128xf32>
    %11 = tpu.matmul %10, %2, %cst_11 {dimension_numbers = #tpu.dot_dimension_numbers<[1], [0], [0], [1], [0, 0, 1, 1], [], []>} : vector<4x4xf32>, vector<4x128xf32>, vector<4x128xf32> -> vector<4x128xf32>
    %12 = arith.addf %9, %11 : vector<4x128xf32>
    %c0_12 = arith.constant 0 : index
    %c0_13 = arith.constant 0 : index
    %13 = vector.load %arg8[%c0_12, %c0_13] : memref<4x4xf32, #tpu.memory_space<vmem>>, vector<4x4xf32>
    %cst_14 = arith.constant dense<0.000000e+00> : vector<4x128xf32>
    %14 = tpu.matmul %13, %2, %cst_14 {dimension_numbers = #tpu.dot_dimension_numbers<[1], [0], [0], [1], [0, 0, 1, 1], [], []>} : vector<4x4xf32>, vector<4x128xf32>, vector<4x128xf32> -> vector<4x128xf32>
    %c0_15 = arith.constant 0 : index
    %c0_16 = arith.constant 0 : index
    %15 = vector.load %arg1[%c0_15, %c0_16] : memref<1x128xf32, #tpu.memory_space<vmem>>, vector<1x128xf32>
    %c0_17 = arith.constant 0 : index
    %c0_18 = arith.constant 0 : index
    %16 = vector.load %arg2[%c0_17, %c0_18] : memref<1x128xf32, #tpu.memory_space<vmem>>, vector<1x128xf32>
    %c1_i32 = arith.constant 1 : i32
    %17 = tpu.dynamic_rotate %12 by %c1_i32 dim 1 : vector<4x128xf32>, i32 -> vector<4x128xf32>
    %18 = vector.broadcast %15 : vector<1x128xf32> to vector<4x128xf32>
    %19 = arith.mulf %17, %18 : vector<4x128xf32>
    %c8_i32 = arith.constant 8 : i32
    %20 = tpu.dynamic_rotate %7 by %c8_i32 dim 1 : vector<4x128xf32>, i32 -> vector<4x128xf32>
    %21 = vector.broadcast %16 : vector<1x128xf32> to vector<4x128xf32>
    %22 = arith.mulf %20, %21 : vector<4x128xf32>
    %c9_i32 = arith.constant 9 : i32
    %23 = tpu.dynamic_rotate %14 by %c9_i32 dim 1 : vector<4x128xf32>, i32 -> vector<4x128xf32>
    %24 = arith.mulf %15, %16 : vector<1x128xf32>
    %25 = vector.broadcast %24 : vector<1x128xf32> to vector<4x128xf32>
    %26 = arith.mulf %23, %25 : vector<4x128xf32>
    %27 = arith.addf %4, %19 : vector<4x128xf32>
    %28 = arith.addf %27, %22 : vector<4x128xf32>
    %29 = arith.addf %28, %26 : vector<4x128xf32>
    %c0_19 = arith.constant 0 : index
    %c0_20 = arith.constant 0 : index
    %30 = vector.load %arg9[%c0_19, %c0_20] : memref<4x1xf32, #tpu.memory_space<vmem>>, vector<4x1xf32>
    %31 = vector.broadcast %30 : vector<4x1xf32> to vector<4x128xf32>
    %32 = arith.addf %29, %31 : vector<4x128xf32>
    %c0_21 = arith.constant 0 : index
    %c0_22 = arith.constant 0 : index
    %33 = vector.load %arg10[%c0_21, %c0_22] : memref<4x128xf32, #tpu.memory_space<vmem>>, vector<4x128xf32>
    tpu.vector_store %arg10[%c0_21, %c0_22], %32 {strides = array<i32>} : memref<4x128xf32, #tpu.memory_space<vmem>>, vector<4x128xf32>,
    return
  }
  func.func @transform_0(%arg0: i32) -> (i32, i32) {
    %c0_i32 = arith.constant 0 : i32
    %c0_i32_0 = arith.constant 0 : i32
    return %c0_i32, %arg0 : i32, i32
  }
  func.func @transform_1(%arg0: i32) -> (i32, i32) {
    %c0_i32 = arith.constant 0 : i32
    %c0_i32_0 = arith.constant 0 : i32
    return %c0_i32, %arg0 : i32, i32
  }
  func.func @transform_2(%arg0: i32) -> (i32, i32) {
    %c0_i32 = arith.constant 0 : i32
    %c0_i32_0 = arith.constant 0 : i32
    return %c0_i32, %arg0 : i32, i32
  }
  func.func @transform_3(%arg0: i32) -> (i32, i32) {
    %c0_i32 = arith.constant 0 : i32
    %c0_i32_0 = arith.constant 0 : i32
    %c0_i32_1 = arith.constant 0 : i32
    return %c0_i32, %c0_i32_0 : i32, i32
  }
  func.func @transform_4(%arg0: i32) -> (i32, i32) {
    %c0_i32 = arith.constant 0 : i32
    %c0_i32_0 = arith.constant 0 : i32
    %c0_i32_1 = arith.constant 0 : i32
    return %c0_i32, %c0_i32_0 : i32, i32
  }
  func.func @transform_5(%arg0: i32) -> (i32, i32) {
    %c0_i32 = arith.constant 0 : i32
    %c0_i32_0 = arith.constant 0 : i32
    %c0_i32_1 = arith.constant 0 : i32
    return %c0_i32, %c0_i32_0 : i32, i32
  }
  func.func @transform_6(%arg0: i32) -> (i32, i32) {
    %c0_i32 = arith.constant 0 : i32
    %c0_i32_0 = arith.constant 0 : i32
    %c0_i32_1 = arith.constant 0 : i32
    return %c0_i32, %c0_i32_0 : i32, i32
  }
  func.func @transform_7(%arg0: i32) -> (i32, i32) {
    %c0_i32 = arith.constant 0 : i32
    %c0_i32_0 = arith.constant 0 : i32
    %c0_i32_1 = arith.constant 0 : i32
    return %c0_i32, %c0_i32_0 : i32, i32
  }
  func.func @transform_8(%arg0: i32) -> (i32, i32) {
    %c0_i32 = arith.constant 0 : i32
    %c0_i32_0 = arith.constant 0 : i32
    %c0_i32_1 = arith.constant 0 : i32
    return %c0_i32, %c0_i32_0 : i32, i32
  }
  func.func @transform_9(%arg0: i32) -> (i32, i32) {
    %c0_i32 = arith.constant 0 : i32
    %c0_i32_0 = arith.constant 0 : i32
    return %c0_i32, %arg0 : i32, i32
  }
}

</mosaic_0001>

<bundles_post_ra>
// kernel: downsample_forward.1
= control target key start
LH: loop header
LB: loop body
LE: loop exit
PB: predicated region body
PF: predicated region fallthrough
CT: control target
= control target key end

     0   :  { %v519_v0 = vmov 0.0   ;;  %vm118_vm0 = vcmask 1043456   ;;  %vm520_vm1 = vmmov 0   ;;  %vm114_vm2 = vcmask 31744   ;;  %s524_s20 = smov 9   ;;  %s620_s2 = inlined_call_operand.vmem [shape: f32[16,128], index: 2, kind: input, shape index: {}]   ;;  %s621_s6 = inlined_call_operand.vmem [shape: f32[4,4], index: 6, kind: input, shape index: {}]   ;;  %s622_s4 = inlined_call_operand.vmem [shape: f32[4,8], index: 4, kind: input, shape index: {}]   ;;  %s623_s7 = inlined_call_operand.vmem [shape: f32[4,4], index: 7, kind: input, shape index: {}]   ;;  %s624_s5 = inlined_call_operand.vmem [shape: f32[4,4], index: 5, kind: input, shape index: {}]   ;;  %s625_s3 = inlined_call_operand.vmem [shape: f32[4,16], index: 3, kind: input, shape index: {}]   ;;  %s626_s8 = inlined_call_operand.vmem [shape: f32[4,1], index: 8, kind: input, shape index: {}]   ;;  %s627_s0 = inlined_call_operand.vmem [shape: f32[1,128], index: 0, kind: input, shape index: {}]   ;;  %s628_s1 = inlined_call_operand.vmem [shape: f32[1,128], index: 1, kind: input, shape index: {}]   ;;  %s629_s9 = inlined_call_operand.vmem [shape: f32[4,128], index: 9, kind: output, shape index: {}]  }
   0x1   :  { %484 = vmatprep.subr.mxu1 %v519_v0  ;;  %v32_v1 = vld [vmem:[%s620_s2] sm:$0xff]  ;;  %v33_v2 = vld [vmem:[%s620_s2 + $0x8] sm:$0xff]  ;;  %486 = vmatprep.mubr.msk.f32.mxu1 %vm520_vm1, %v519_v0  ;;  %vm36_vm3 = vcmask 64512   ;;  %v521_v9 = vmov 0.0|0.0   ;;  %vm372_vm4 = vcmask 130048   ;;  %v522_v12 = vmov 0  }
   0x2   :  { %v113_v3 = vrot.slane %v33_v2, 4  ;;  %v192_v4 = vrot.slane %v32_v1, 4  ;;  %v111_v5 = vld [vmem:[%s621_s6] sm:$0xf]  ;;  %479 = vmatprep.subr.mxu0 %v519_v0  ;;  %481 = vmatprep.mubr.msk.f32.mxu0 %vm520_vm1, %v519_v0  ;;  %v507_v8 = vpack.c.bf16 %v33_v2, %v32_v1  ;;  %v347_v22 = vlaneseq }
   0x3   :  { %v35_v6 = vld [vmem:[%s622_s4] sm:$0xf]  ;;  %480 = vmatpush3.msra.mxu0 %v33_v2  ;;  %518 = vset.pattern.permute.xlu0 %v522_v12 }
   0x4   :  { %485 = vmatpush3.msk.msra.mxu1 %vm118_vm0, %v113_v3  ;;  %482 = vmatmul.mubr.msk.f32.vlgmr.msra.gmra.mrb[0].mxu0 %vm36_vm3, %v35_v6  ;;  %v268_v7 = vld [vmem:[%s623_s7] sm:$0xf]  ;;  %s523_s7 = smov 8   ;;  %v348_v23 = vshrl.u32 %v347_v22, 7 }
   0x5   :  { %487 = vmatmul.mubr.msk.f32.vlgmr.msra.gmra.mrb[0].mxu1 %vm114_vm2, %v111_v5  ;;  %489 = vmatprep.subr.mxu1 %v519_v0  ;;  %v110_v10 = vld [vmem:[%s624_s5] sm:$0xf]  ;;  %s525_s5 = smov 1  }
   0x6   :  { %490 = vmatpush3.msk.msra.mxu1 %vm118_vm0, %v192_v4  ;;  %491 = vmatprep.mubr.msk.f32.mxu1 %vm520_vm1, %v519_v0  ;;  %v34_v11 = vld [vmem:[%s625_s3] sm:$0xf]  ;;  %v349_v24 = vsub.s32 0, %v348_v23 }
   0x7   :  { %494 = vmatprep.subr.mxu0 %v519_v0  ;;  %496 = vmatprep.mubr.msk.f32.mxu0 %vm520_vm1, %v519_v0  ;;  %v448_v21 = vld [vmem:[%s626_s8] sm:$0xf] }
   0x8   :  { %495 = vmatpush3.msk.msra.mxu0 %vm118_vm0, %v113_v3  ;;  %v342_v25 = vld [vmem:[%s627_s0] sm:$0x1] }
   0x9   :  { %497 = vmatmul.mubr.msk.f32.vlgmr.msra.gmra.mrb[2].mxu0 %vm114_vm2, %v268_v7  ;;  %506 = vmatprep.subr.bf16.mxu0 %v521_v9  ;;  %v350_v26 = vrot.slane %v342_v25, %v349_v24  ;;  %v343_v27 = vld [vmem:[%s628_s1] sm:$0x1] }
   0xa   :  { %508 = vmatpush3.bf16.msra.mxu0 %v507_v8  ;;  %503 = vmatprep.mubr.msk.f32.mxu0 %vm520_vm1, %v519_v0  ;;  %v359_v30 = vrot.slane %v343_v27, %v349_v24  ;;  %v364_v32 = vmul.f32 %v343_v27, %v342_v25 }
   0xc   :  { %v369_v35 = vrot.slane %v364_v32, %v349_v24 }
   0xd   :  { %492 = vmatmul.mubr.msk.f32.vlgmr.msra.gmra.mrb[0].mxu1 %vm114_vm2, %v110_v10  ;;  %504 = vmatmul.mubr.msk.f32.vlgmr.msra.gmra.mrb[4].mxu0 %vm372_vm4, %v34_v11 }
  0xd7   :  { %v106_v13 = vpop.f32.mrb[0].mxu0 }
  0xd8   :  { %353 = vrot.lane.b32.xlu1 %v106_v13, %s523_s7  ;;  %v483_v14 = vpop.f32.mrb[1].mxu0 }
  0xdc   :  { %v338_v15 = vpop.f32.mrb[2].mxu0 }
  0xdd   :  { %362 = vrot.lane.b32.xlu1 %v338_v15, %s524_s20  ;;  %v498_v16 = vpop.f32.mrb[3].mxu0 }
  0xe0   :  { %v264_v17 = vpop.f32.mrb[0].mxu1  ;;  %v442_v18 = vpop.f32.mrb[4].mxu0 }
  0xe1   :  { %344 = vrot.lane.b32.xlu0 %v264_v17, %s525_s5  ;;  %v493_v19 = vpop.f32.mrb[1].mxu1  ;;  %v505_v20 = vpop.f32.mrb[5].mxu0 }
  0xe5   :  { %451 = vperm.xlu0 %518, %v448_v21  }
 0x14a   :  { %v354_v29 = vpop.permute.xlu1 %353 }
 0x14b   :  { %v361_v33 = vmul.f32 %v359_v30, %v354_v29 }
 0x14f   :  { %v363_v36 = vpop.permute.xlu1 %362 }
 0x150   :  { %v371_v38 = vmul.f32 %v369_v35, %v363_v36 }
 0x153   :  { %v345_v28 = vpop.permute.xlu0 %344 }
 0x154   :  { %v352_v31 = vmul.f32 %v350_v26, %v345_v28 }
 0x156   :  { %v443_v34 = vadd.f32 %v442_v18, %v352_v31 }
 0x158   :  { %v446_v37 = vadd.f32 %v443_v34, %v361_v33 }
 0x15a   :  { %v447_v39 = vadd.f32 %v446_v37, %v371_v38 }
 0x164   :  { %v452_v40 = vpop.permute.xlu0 %451 }
 0x165   :  { %v454_v41 = vadd.f32 %v452_v40, %v447_v39 }
 0x167   :  { %455 = vst [vmem:[%s629_s9] sm:$0xf] %v454_v41 }

</bundles_post_ra>
